<compile_context>
chip_gen: v7x
topology: tpu7x:2x2x1
jax: 0.10.0
libtpu: 0.0.40
codegen_flags: <defaults>
</compile_context>

<pallas_src>
import functools
import math

import jax
import jax.numpy as jnp
from jax.experimental import pallas as pl
from jax.experimental.pallas import tpu as pltpu

EPS = 1e-6


def _layernorm_kernel(x_ref, gb_ref, o_ref, *, feat, feat_pad):
    """One row-tile of the custom LayerNorm.

    x_ref:  (tile_rows, feat_pad) input rows
    gb_ref: (8, feat_pad) slab; row 0 = gamma, row 1 = beta (feature-padded 0)
    o_ref:  like x_ref
    """
    x = x_ref[...].astype(jnp.float32)
    gamma = gb_ref[0:1, :].astype(jnp.float32)
    beta = gb_ref[1:2, :].astype(jnp.float32)

    # Two-pass moments: extra VPU/XLU work is free under the HBM roofline and
    # avoids the E[x^2] - E[x]^2 cancellation risk.
    mean = jnp.sum(x, axis=-1, keepdims=True) * (1.0 / feat)
    d = x - mean
    if feat != feat_pad:
        # Zero-padded feature lanes would each contribute mean^2 -> mask them.
        lane = jax.lax.broadcasted_iota(jnp.int32, d.shape, d.ndim - 1)
        dm = jnp.where(lane < feat, d, 0.0)
    else:
        dm = d
    var = jnp.sum(dm * dm, axis=-1, keepdims=True) * (1.0 / (feat - 1))  # N-1 (torch .std)
    std = jnp.sqrt(var)
    inv = 1.0 / (std + EPS)  # exact divide; EUP slot has slack (mem-bound)
    o_ref[...] = (d * inv * gamma + beta).astype(o_ref.dtype)


def _vmem_capacity_bytes():
    try:
        return int(pltpu.get_tpu_info().vmem_capacity_bytes)
    except Exception:
        return 64 * 1024 * 1024  # assume the smallest generation (v7x per-TC)


def layer_norm(x, gamma, beta):
    """Custom LayerNorm over the last dim of x (arbitrary leading shape)."""
    orig_shape = x.shape
    feat = orig_shape[-1]
    rows = math.prod(orig_shape[:-1])

    itemsize = jnp.dtype(x.dtype).itemsize
    pack = max(8, 32 // itemsize)                 # sublane packing (f32:8, bf16:16)
    feat_pad = -(-feat // 128) * 128              # lane-dense last dim

    # Tile sizing: pure byte budget, generation-aware.
    # Per-row working set across the pipeline: double-buffered input + output
    # blocks in x.dtype (2x each) plus ~3 f32-wide temporaries in the body.
    vmem_cap = _vmem_capacity_bytes()
    budget = (vmem_cap * 3) // 8
    bytes_per_row = feat_pad * (4 * itemsize + 3 * 4)
    tile_rows = max(pack, (budget // bytes_per_row) // pack * pack)
    tile_rows = min(tile_rows, -(-rows // pack) * pack)   # no bigger than problem
    vmem_limit = min((vmem_cap * 5) // 8, 80 * 1024 * 1024)

    xf = x.reshape(rows, feat)
    if feat_pad != feat:
        xf = jnp.pad(xf, ((0, 0), (0, feat_pad - feat)))   # rare: F % 128 != 0

    gb = jnp.zeros((8, feat_pad), jnp.float32)              # sublane-aligned slab
    gb = gb.at[0, :feat].set(gamma.astype(jnp.float32))
    gb = gb.at[1, :feat].set(beta.astype(jnp.float32))

    kernel = functools.partial(_layernorm_kernel, feat=feat, feat_pad=feat_pad)
    out = pl.pallas_call(
        kernel,
        out_shape=jax.ShapeDtypeStruct((rows, feat_pad), x.dtype),
        grid_spec=pltpu.PrefetchScalarGridSpec(
            num_scalar_prefetch=0,
            grid=(pl.cdiv(rows, tile_rows),),       # ragged last tile is clipped
            in_specs=[
                pl.BlockSpec((tile_rows, feat_pad), lambda i: (i, 0)),
                pl.BlockSpec((8, feat_pad), lambda i: (0, 0)),
            ],
            out_specs=pl.BlockSpec((tile_rows, feat_pad), lambda i: (i, 0)),
        ),
        compiler_params=pltpu.CompilerParams(
            dimension_semantics=("parallel",),       # rows independent -> megacore
            vmem_limit_bytes=vmem_limit),
    )(xf, gb)

    if feat_pad != feat:
        out = out[:, :feat]
    return out.reshape(orig_shape)


def encoder_forward(x, mask, gamma, beta):
    # TODO(synk): the Encoder's nn.ModuleList sublayers (layer(x, mask)) are
    # abstract in the spec, so `x` stands in for the sublayer-stack output and
    # `mask` is unused; only the final self.norm(x) is computed on-TPU.
    del mask
    return layer_norm(x, gamma, beta)


def _reference(x, gamma, beta):
    xf = x.astype(jnp.float32)
    mean = jnp.mean(xf, axis=-1, keepdims=True)
    d = xf - mean
    var = jnp.sum(d * d, axis=-1, keepdims=True) / (x.shape[-1] - 1)
    std = jnp.sqrt(var)
    return (gamma * d / (std + EPS) + beta).astype(x.dtype)


if __name__ == "__main__":
    key = jax.random.PRNGKey(0)

    # (shape, description) — covers the even case, a ragged row tile, and a
    # non-128-multiple feature dim (feature padding + lane mask path).
    cases = [
        ((2, 8, 128), "even"),
        ((3, 5, 128), "ragged rows"),
        ((2, 5, 96), "padded features"),
    ]

    for shape, name in cases:
        key, kx = jax.random.split(key)
        B, S, F = shape
        x = jax.random.normal(kx, shape, dtype=jnp.float32)
        mask = jnp.ones((B, 1, S, S), dtype=jnp.float32)   # unused by the norm

        # Parameter init matching LayerNorm.__init__ (gamma = beta = ones).
        gamma = jnp.ones((F,), dtype=jnp.float32)
        beta = jnp.ones((F,), dtype=jnp.float32)

        out = encoder_forward(x, mask, gamma, beta)
        out = jax.block_until_ready(out)

        ref = _reference(x, gamma, beta)
        assert out.shape == x.shape and out.dtype == x.dtype, name
        assert jnp.allclose(out, ref, atol=1e-4, rtol=1e-4), f"mismatch: {name}"

    print("KERNEL_OK")
</pallas_src>

<mosaic_0001>
module attributes {stable_mosaic.version = 11 : i64} {
  func.func @_layernorm_kernel(%arg0: i32, %arg1: memref<16x128xf32, #tpu.memory_space<vmem>>, %arg2: memref<8x128xf32, #tpu.memory_space<vmem>>, %arg3: memref<16x128xf32, #tpu.memory_space<vmem>>) attributes {dimension_semantics = [#tpu.dimension_semantics<parallel>], iteration_bounds = array<i64: 1>, scalar_prefetch = 0 : i64, scratch_operands = 0 : i64, tpu.core_type = #tpu.core_type<tc>, window_params = [{transform_indices = @transform_0, window_bounds = array<i64: 16, 128>}, {pipeline_mode = #tpu.pipeline_mode<synchronous>, transform_indices = @transform_1, window_bounds = array<i64: 8, 128>}, {transform_indices = @transform_2, window_bounds = array<i64: 16, 128>}]} {
    %c0 = arith.constant 0 : index
    %c0_0 = arith.constant 0 : index
    %0 = vector.load %arg1[%c0, %c0_0] : memref<16x128xf32, #tpu.memory_space<vmem>>, vector<16x128xf32>
    %c0_1 = arith.constant 0 : index
    %c0_2 = arith.constant 0 : index
    %1 = vector.load %arg2[%c0_1, %c0_2] : memref<8x128xf32, #tpu.memory_space<vmem>>, vector<1x128xf32>
    %c1 = arith.constant 1 : index
    %c0_3 = arith.constant 0 : index
    %2 = vector.load %arg2[%c1, %c0_3] : memref<8x128xf32, #tpu.memory_space<vmem>>, vector<1x128xf32>
    %cst = arith.constant dense<0.000000e+00> : vector<16xf32>
    %3 = vector.multi_reduction <add>, %0, %cst [1] : vector<16x128xf32> to vector<16xf32>
    %4 = vector.shape_cast %3 : vector<16xf32> to vector<16x1xf32>
    %cst_4 = arith.constant 7.812500e-03 : f32
    %5 = vector.broadcast %cst_4 : f32 to vector<16x1xf32>
    %6 = arith.mulf %4, %5 : vector<16x1xf32>
    %7 = vector.broadcast %6 : vector<16x1xf32> to vector<16x128xf32>
    %8 = arith.subf %0, %7 : vector<16x128xf32>
    %9 = arith.mulf %8, %8 : vector<16x128xf32>
    %cst_5 = arith.constant dense<0.000000e+00> : vector<16xf32>
    %10 = vector.multi_reduction <add>, %9, %cst_5 [1] : vector<16x128xf32> to vector<16xf32>
    %11 = vector.shape_cast %10 : vector<16xf32> to vector<16x1xf32>
    %cst_6 = arith.constant 0.00787401571 : f32
    %12 = vector.broadcast %cst_6 : f32 to vector<16x1xf32>
    %13 = arith.mulf %11, %12 : vector<16x1xf32>
    %14 = math.sqrt %13 : vector<16x1xf32>
    %cst_7 = arith.constant 9.99999997E-7 : f32
    %15 = vector.broadcast %cst_7 : f32 to vector<16x1xf32>
    %16 = arith.addf %14, %15 : vector<16x1xf32>
    %cst_8 = arith.constant 1.000000e+00 : f32
    %17 = vector.broadcast %cst_8 : f32 to vector<16x1xf32>
    %18 = arith.divf %17, %16 : vector<16x1xf32>
    %19 = vector.broadcast %18 : vector<16x1xf32> to vector<16x128xf32>
    %20 = arith.mulf %8, %19 : vector<16x128xf32>
    %21 = vector.broadcast %1 : vector<1x128xf32> to vector<16x128xf32>
    %22 = arith.mulf %20, %21 : vector<16x128xf32>
    %23 = vector.broadcast %2 : vector<1x128xf32> to vector<16x128xf32>
    %24 = arith.addf %22, %23 : vector<16x128xf32>
    %c0_9 = arith.constant 0 : index
    %c0_10 = arith.constant 0 : index
    %25 = vector.load %arg3[%c0_9, %c0_10] : memref<16x128xf32, #tpu.memory_space<vmem>>, vector<16x128xf32>
    tpu.vector_store %arg3[%c0_9, %c0_10], %24 {strides = array<i32>} : memref<16x128xf32, #tpu.memory_space<vmem>>, vector<16x128xf32>,
    return
  }
  func.func @transform_0(%arg0: i32) -> (i32, i32) {
    %c0_i32 = arith.constant 0 : i32
    %c0_i32_0 = arith.constant 0 : i32
    return %arg0, %c0_i32 : i32, i32
  }
  func.func @transform_1(%arg0: i32) -> (i32, i32) {
    %c0_i32 = arith.constant 0 : i32
    %c0_i32_0 = arith.constant 0 : i32
    %c0_i32_1 = arith.constant 0 : i32
    return %c0_i32, %c0_i32_0 : i32, i32
  }
  func.func @transform_2(%arg0: i32) -> (i32, i32) {
    %c0_i32 = arith.constant 0 : i32
    %c0_i32_0 = arith.constant 0 : i32
    return %arg0, %c0_i32 : i32, i32
  }
}

</mosaic_0001>

<bundles_post_ra>
// kernel: tpu_custom_call.1
= control target key start
LH: loop header
LB: loop body
LE: loop exit
PB: predicated region body
PF: predicated region fallthrough
CT: control target
= control target key end

     0   :  { %7 = vsyncpa [#allocation3], 0  ;;  %s261_s0 = inlined_call_operand.hbm [shape: f32[16,128], index: 0, kind: input, shape index: {}]   ;;  %s262_s1 = inlined_call_operand.hbm [shape: f32[8,128], index: 1, kind: input, shape index: {}]   ;;  %s263_s2 = inlined_call_operand.hbm [shape: f32[16,128], index: 2, kind: output, shape index: {}]  }
   0x1   :  { %8 = vsyncpa [#allocation6], 0 }
   0x2   :  { %9 = vsyncpa [#allocation4], 0  ;;  %s199_s9 = smov [#allocation2]   ;;  %s127_s13 = scalar_lea.hbm %s261_s0, 256 }
   0x3   :  { %s15_s10 = sshll.u32 %s199_s9, 4  ;;  %p128_p0 = scmp.ne.s32.totalorder %s261_s0, %s127_s13  ;;  %s16_s10 = int_to_ptr.vmem [resolvable:$true] %s15_s10 }
   0x4   :  { %p131_p1 = scmp.lt.u32.totalorder %s127_s13, %s261_s0 }
   0x6   :  { %p133_p2 = pnand %p131_p1, %p128_p0 }
   0x8   :  { %136 = shalt.err (!%p133_p2)
}
   0x9   :  { %s137_s18 = scalar_lea.vmem %s16_s10, 256  ;;  %p142_p4 = scmp.lt.s32.totalorder %s16_s10, %s16_s10 }
   0xa   :  { %p138_p3 = scmp.ne.s32.totalorder %s16_s10, %s137_s18  ;;  %p143_p5 = scmp.lt.s32.totalorder %s137_s18, %s137_s18 }
   0xc   :  { %p144_p6 = por %p143_p5, %p142_p4 }
   0xe   :  { %p145_p7 = pnand %p144_p6, %p138_p3 }
  0x10   :  { %148 = shalt.err (!%p145_p7)
}
  0x11   :  { %s200_s19 = smov 128   ;;  %s201_s20 = smov 8  }
  0x12   :  { %21 = dma.hbm_to_vmem [thread:$0]  %s261_s0, 256, %s16_s10, [#allocation3], %s200_s19, %s200_s19, %s201_s20  }
  0x13   :  { %s202_s23 = smov [#allocation5]   ;;  %s149_s27 = scalar_lea.hbm %s262_s1, 128 }
  0x14   :  { %s28_s24 = sshll.u32 %s202_s23, 4  ;;  %p150_p8 = scmp.ne.s32.totalorder %s262_s1, %s149_s27  ;;  %s29_s24 = int_to_ptr.vmem [resolvable:$true] %s28_s24 }
  0x15   :  { %p153_p9 = scmp.lt.u32.totalorder %s149_s27, %s262_s1 }
  0x17   :  { %p155_p10 = pnand %p153_p9, %p150_p8 }
  0x19   :  { %158 = shalt.err (!%p155_p10)
}
  0x1a   :  { %s159_s4 = scalar_lea.vmem %s29_s24, 128  ;;  %p164_p12 = scmp.lt.s32.totalorder %s29_s24, %s29_s24 }
  0x1b   :  { %p160_p11 = scmp.ne.s32.totalorder %s29_s24, %s159_s4  ;;  %p165_p13 = scmp.lt.s32.totalorder %s159_s4, %s159_s4 }
  0x1d   :  { %p166_p0 = por %p165_p13, %p164_p12 }
  0x1f   :  { %p167_p1 = pnand %p166_p0, %p160_p11 }
  0x21   :  { %170 = shalt.err (!%p167_p1)
}
  0x22   :  { %31 = dma.hbm_to_vmem [thread:$0]  %s262_s1, 128, %s29_s24, [#allocation6]  }
  0x23   :  { %193 = dma.done.wait [#allocation3], 256  }
  0x24   :  { %194 = vsyncadd [#allocation3], 4294967040 }
  0x25   :  { %195 = dma.done.wait [#allocation6], 128  }
  0x26   :  { %196 = vsyncadd [#allocation6], 4294967168  ;;  %v38_v0 = vld [vmem:[#allocation2] sm:$0xff]  ;;  %v39_v1 = vld [vmem:[#allocation2 + $0x8] sm:$0xff]  ;;  %s203_s1 = smov [#allocation7]  }
  0x27   :  { %42 = vadd.xlane.f32.xlu0 %v38_v0  ;;  %v112_v27 = vld [vmem:[#allocation5] ss:$0 sm:$0xff]  ;;  %v113_v29 = vld [vmem:[#allocation5 + $0x1] ss:$0 sm:$0xff]  ;;  %s99_s6 = sshll.u32 %s203_s1, 4  ;;  %s100_s6 = int_to_ptr.vmem [resolvable:$true] %s99_s6 }
  0x28   :  { %s171_s7 = scalar_lea.vmem %s100_s6, 256  ;;  %p176_p3 = scmp.lt.s32.totalorder %s100_s6, %s100_s6 }
  0x29   :  { %p172_p2 = scmp.ne.s32.totalorder %s100_s6, %s171_s7  ;;  %p177_p4 = scmp.lt.s32.totalorder %s171_s7, %s171_s7 }
  0x2b   :  { %44 = vadd.xlane.f32.xlu0 %v39_v1  ;;  %p178_p5 = por %p177_p4, %p176_p3 }
  0x2d   :  { %p179_p6 = pnand %p178_p5, %p172_p2 }
  0xb4   :  { %v43_v2 = vpop.xlane.xlu0 %42 }
  0xb5   :  { %v46_v3 = vmul.f32 0.0078125, %v43_v2 }
  0xb7   :  { %v48_v4 = vsub.f32 %v38_v0, %v46_v3 }
  0xb8   :  { %v45_v5 = vpop.xlane.xlu0 %44 }
  0xb9   :  { %v47_v6 = vmul.f32 0.0078125, %v45_v5  ;;  %v50_v7 = vmul.f32 %v48_v4, %v48_v4 }
  0xbb   :  { %v49_v8 = vsub.f32 %v39_v1, %v47_v6  ;;  %52 = vadd.xlane.f32.xlu1 %v50_v7 }
  0xbd   :  { %v51_v9 = vmul.f32 %v49_v8, %v49_v8 }
  0xbf   :  { %54 = vadd.xlane.f32.xlu1 %v51_v9 }
 0x148   :  { %v53_v10 = vpop.xlane.xlu1 %52 }
 0x149   :  { %v56_v11 = vmul.f32 0.007874016, %v53_v10 }
 0x14b   :  { %119 = vrsqrt.f32 %v56_v11  ;;  %vm60_vm0 = vcmp.eq.f32.partialorder %v56_v11, inf  ;;  %v63_v16 = vand.u32 2147483648, %v56_v11  ;;  %vm62_vm1 = vcmp.eq.f32.partialorder %v56_v11, 0.0 }
 0x14c   :  { %v55_v12 = vpop.xlane.xlu1 %54 }
 0x14d   :  { %v57_v13 = vmul.f32 0.007874016, %v55_v12 }
 0x14f   :  { %121 = vrsqrt.f32 %v57_v13  ;;  %vm67_vm2 = vcmp.eq.f32.partialorder %v57_v13, inf  ;;  %v70_v22 = vand.u32 2147483648, %v57_v13  ;;  %vm69_vm3 = vcmp.eq.f32.partialorder %v57_v13, 0.0 }
 0x155   :  { %v120_v14 = vpop.eup %119 }
 0x156   :  { %v59_v15 = vmul.f32 %v120_v14, %v56_v11 }
 0x158   :  { %v61_v17 = vsel %vm60_vm0, %v56_v11, %v59_v15 }
 0x159   :  { %v122_v18 = vpop.eup %121  ;;  %v64_v19 = vsel %vm62_vm1, %v63_v16, %v61_v17 }
 0x15a   :  { %v66_v20 = vmul.f32 %v122_v18, %v57_v13  ;;  %v72_v21 = vadd.f32 1e-06, %v64_v19 }
 0x15c   :  { %v68_v23 = vsel %vm67_vm2, %v57_v13, %v66_v20  ;;  %123 = vrcp.f32 %v72_v21 }
 0x15d   :  { %v71_v24 = vsel %vm69_vm3, %v70_v22, %v68_v23 }
 0x15e   :  { %v73_v25 = vadd.f32 1e-06, %v71_v24 }
 0x160   :  { %125 = vrcp.f32 %v73_v25 }
 0x166   :  { %v124_v26 = vpop.eup %123 }
 0x167   :  { %v78_v28 = vmul.f32 %v124_v26, %v48_v4 }
 0x169   :  { %v84_v30 = vmul.f32 %v112_v27, %v78_v28 }
 0x16a   :  { %v126_v31 = vpop.eup %125 }
 0x16b   :  { %v79_v32 = vmul.f32 %v126_v31, %v49_v8  ;;  %v90_v33 = vadd.f32 %v113_v29, %v84_v30 }
 0x16d   :  { %v85_v34 = vmul.f32 %v112_v27, %v79_v32  ;;  %92 = vst [vmem:[#allocation7] sm:$0xff] %v90_v33 }
 0x16f   :  { %v91_v35 = vadd.f32 %v113_v29, %v85_v34 }
 0x171   :  { %93 = vst [vmem:[#allocation7 + $0x8] sm:$0xff] %v91_v35 }
 0x172   :  { %182 = shalt.err (!%p179_p6)
}
 0x173   :  { %s183_s10 = scalar_lea.hbm %s263_s2, 256 }
 0x174   :  { %p184_p7 = scmp.ne.s32.totalorder %s263_s2, %s183_s10  ;;  %p187_p8 = scmp.lt.u32.totalorder %s183_s10, %s263_s2 }
 0x176   :  { %p189_p9 = pnand %p187_p8, %p184_p7 }
 0x178   :  { %192 = shalt.err (!%p189_p9)
}
 0x179   :  { %105 = dma.vmem_to_hbm [thread:$0]  %s100_s6, 256, %s263_s2, [#allocation4], %s200_s19, %s200_s19, %s201_s20  }
 0x17a   :  { %197 = dma.done.wait [#allocation4], 256  }
 0x17b   :  { %198 = vsyncadd [#allocation4], 4294967040 }
 0x17c   :  { %109 = vsyncpa [#allocation3], 1 }
 0x17d   :  { %110 = vsyncpa [#allocation6], 1 }
 0x17e   :  { %111 = vsyncpa [#allocation4], 1 }

</bundles_post_ra>
